<compile_context>
chip_gen: v6e
topology: v6e:2x2x1
jax: 0.10.0
libtpu: 0.0.40
codegen_flags: <defaults>
</compile_context>

<pallas_src>
import functools
import math

import jax
import jax.numpy as jnp
from jax import lax
from jax.experimental import pallas as pl
from jax.experimental.pallas import tpu as pltpu


# ----------------------------------------------------------------------------
# Generation-dependent configuration helpers
# ----------------------------------------------------------------------------
@functools.lru_cache(maxsize=None)
def _tpu_vmem_capacity_bytes():
    try:
        return int(pltpu.get_tpu_info().vmem_capacity_bytes)
    except Exception:
        return 64 * 1024 * 1024          # conservative fallback (v7x physical VMEM)


def _vmem_limit_bytes():
    # ~85% of physical VMEM: ~54 MiB on v7x (64 MiB), ~108 MiB on v5e/v6e
    # (128 MiB) — leaves headroom for compiler scratch + double buffers.
    return int(_tpu_vmem_capacity_bytes() * 0.85)


def _default_tm():
    # Bigger row tiles amortize the ~0.35 us per-grid-step overhead; 1024 only
    # where the 128 MiB parts (v5e/v6e) give room, 512 on v7x (64 MiB).
    return 1024 if _tpu_vmem_capacity_bytes() >= (96 << 20) else 512


@functools.lru_cache(maxsize=None)
def _has_bf16_vpu_eup():
    # v6e / v7x have bf16 VPU+EUP (cheap bf16 exp); v2-v5 do not.
    try:
        kind = jax.devices()[0].device_kind.lower()
    except Exception:
        return False
    return not any(v in kind for v in ("v2", "v3", "v4", "v5"))


def _choose_tm(M, tm):
    """Row-tile size: as big as possible, but keep ~8 grid steps when M is
    large so DMA pipelining + megacore/2-TC sharding have work to overlap."""
    tm = min(tm, M)
    if M > 256:
        steps_tile = ((pl.cdiv(M, 8) + 7) // 8) * 8     # ~8 steps, 8-aligned
        tm = min(tm, max(8, steps_tile))
    if tm < M:
        tm = max(8, (tm // 8) * 8)                       # sublane (8) rule
    return tm


# ----------------------------------------------------------------------------
# Kernel 1: fused multi-output linear   y_i = x @ W_i + b_i
#   - x tile loaded once per grid step and reused for every output head
#     (fuses the Q/K/V projections into a single HBM pass over x).
#   - weights/biases have constant index_maps -> fetched once, VMEM resident.
# ----------------------------------------------------------------------------
def _fused_linear_kernel(*refs, n_out, matmul_dtype):
    x_ref = refs[0]
    w_refs = refs[1:1 + n_out]
    b_refs = refs[1 + n_out:1 + 2 * n_out]
    o_refs = refs[1 + 2 * n_out:]

    x = x_ref[...]                                   # (TM, K)
    if matmul_dtype is not None:
        x = x.astype(matmul_dtype)                   # bf16 operands, f32 accum
    for w_ref, b_ref, o_ref in zip(w_refs, b_refs, o_refs):
        w = w_ref[...]                               # (K, N)
        if matmul_dtype is not None:
            w = w.astype(matmul_dtype)
        y = jnp.dot(x, w, preferred_element_type=jnp.float32)
        y = y + b_ref[...].astype(jnp.float32)       # (1, N) broadcast
        o_ref[...] = y.astype(o_ref.dtype)


def fused_linear(x, weights, biases, *, tm=None, matmul_dtype=None, out_dtype=None):
    """x: (M, K); weights[i]: (K, N_i); biases[i]: (N_i,) -> [ (M, N_i) ]."""
    M, K = x.shape
    if tm is None:
        tm = _default_tm()
    if out_dtype is None:
        out_dtype = x.dtype
    n_out = len(weights)
    ns = [int(w.shape[1]) for w in weights]

    tm = _choose_tm(M, tm)
    grid = (pl.cdiv(M, tm),)
    # NOTE: when M % tm != 0 the last x block reads OOB rows; the results for
    # those rows are masked on write, so outputs are correct.

    in_specs = [pl.BlockSpec((tm, K), lambda i: (i, 0))]
    # Resident weights / biases (constant index_map -> fetched once).
    in_specs += [pl.BlockSpec((K, n), lambda i: (0, 0)) for n in ns]
    in_specs += [pl.BlockSpec((1, n), lambda i: (0, 0)) for n in ns]
    out_specs = [pl.BlockSpec((tm, n), lambda i: (i, 0)) for n in ns]
    out_shape = [jax.ShapeDtypeStruct((M, n), out_dtype) for n in ns]

    in_item = jnp.dtype(x.dtype).itemsize
    w_item = jnp.dtype(weights[0].dtype).itemsize
    out_item = jnp.dtype(out_dtype).itemsize
    flops = int(sum(2 * M * K * n for n in ns))
    bytes_accessed = int(in_item * M * K
                         + sum(w_item * (K * n + n) + out_item * M * n for n in ns))

    kernel = functools.partial(
        _fused_linear_kernel, n_out=n_out, matmul_dtype=matmul_dtype)

    return pl.pallas_call(
        kernel,
        out_shape=out_shape,
        grid=grid,
        in_specs=in_specs,
        out_specs=out_specs,
        compiler_params=pltpu.CompilerParams(
            dimension_semantics=("parallel",),
            vmem_limit_bytes=_vmem_limit_bytes()),
        cost_estimate=pl.CostEstimate(
            flops=flops, transcendentals=0, bytes_accessed=bytes_accessed),
    )(x, *weights, *[b.reshape(1, -1) for b in biases])


# ----------------------------------------------------------------------------
# Kernel 2: scaled dot-product attention over one batch element / query block.
#   Inputs : q (1, tq, NH, D), k/v (1, S, NH, D)  (metadata reshape only).
#   Output : (1, tq, H) slab of the (B, S, H) context — heads merged in-kernel,
#            lane-dense store, so the output projection needs no transpose.
# ----------------------------------------------------------------------------
@functools.lru_cache(maxsize=None)
def _structured_merge_ok(num_heads, rows, head_dim):
    """Probe whether Mosaic supports the single swapaxes+reshape head-merge
    relayout at this shape (support is shape/version dependent). If not, the
    attention kernel falls back to a per-head lane concat (always compiles)."""
    def probe(x_ref, o_ref):
        o_ref[...] = jnp.swapaxes(x_ref[...], 0, 1).reshape(
            rows, num_heads * head_dim)
    try:
        x = jnp.zeros((num_heads, rows, head_dim), jnp.float32)
        jax.block_until_ready(pl.pallas_call(
            probe,
            out_shape=jax.ShapeDtypeStruct((rows, num_heads * head_dim),
                                           jnp.float32))(x))
        return True
    except Exception:
        return False


def _mha_kernel(q_ref, k_ref, v_ref, o_ref, *, scale, matmul_dtype,
                softmax_dtype, approx_recip, structured_merge):
    q = q_ref[0]                                     # (tq, NH, D)
    k = k_ref[0]                                     # (S,  NH, D)
    v = v_ref[0]                                     # (S,  NH, D)
    if matmul_dtype is not None:
        q = q.astype(matmul_dtype)
        k = k.astype(matmul_dtype)
        v = v.astype(matmul_dtype)
    # Fold 1/sqrt(D) into Q (tq*NH*D multiplies instead of scaling tq*S scores).
    q = q * scale

    # scores[h, i, j] = sum_d q[i, h, d] * k[j, h, d]; batched over heads via
    # dot_general dimension numbers (no explicit k.T / XLU transpose).
    scores = lax.dot_general(
        q, k, (((2,), (2,)), ((1,), (1,))),
        preferred_element_type=jnp.float32)          # (NH, tq, S) f32

    # Numerically stable softmax: stats (max / row-sum) in f32; the exp itself
    # runs in bf16 on v6e/v7x (bf16 EUP is the binding unit there), f32 on v5e.
    m = jnp.max(scores, axis=-1, keepdims=True)                      # (NH, tq, 1)
    p = jnp.exp((scores - m).astype(softmax_dtype))                  # (NH, tq, S)
    denom = jnp.sum(p.astype(jnp.float32), axis=-1, keepdims=True)   # f32

    # ctx[h, i, d] = sum_j p[h, i, j] * v[j, h, d]
    ctx = lax.dot_general(
        p.astype(v.dtype), v, (((2,), (0,)), ((0,), (1,))),
        preferred_element_type=jnp.float32)          # (NH, tq, D) f32

    # Normalize AFTER the PV matmul: tq*D multiplies instead of tq*S.
    ctx = ctx * pl.reciprocal(denom, approx=approx_recip)

    # Merge heads -> one lane-dense (tq, H) store.
    if structured_merge:
        # Single structured relayout (review-preferred).
        merged = jnp.swapaxes(ctx, 0, 1).reshape(
            ctx.shape[1], ctx.shape[0] * ctx.shape[2])
    else:
        # Fallback: per-head lane concat (known-good Mosaic codegen).
        merged = jnp.concatenate([ctx[h] for h in range(ctx.shape[0])], axis=-1)
    o_ref[0] = merged.astype(o_ref.dtype)


def multi_head_attention(q, k, v, *, num_heads, matmul_dtype=None,
                         softmax_dtype=jnp.float32, approx_recip=True,
                         q_block=256, out_dtype=None):
    """q, k, v: (B, S, H) -> context (B, S, H) with heads already merged."""
    B, S, H = q.shape
    assert H % num_heads == 0
    D = H // num_heads
    if out_dtype is None:
        out_dtype = q.dtype
    scale = 1.0 / math.sqrt(D)

    # Query-block axis: bounds the f32 scores tile (tq*S instead of S*S) and,
    # together with the batch axis, exposes >=2 "parallel" grid steps for the
    # 2-TC parts (v7x) even at small batch.
    tq = min(q_block, S)
    if B * pl.cdiv(S, tq) < 2 and S >= 16:
        tq = (S + 1) // 2
    if tq < S:
        tq = max(8, (tq // 8) * 8)
    n_q = pl.cdiv(S, tq)

    # (B, S, H) -> (B, S, NH, D): metadata-only reshape, no transpose/HBM pass.
    q4 = q.reshape(B, S, num_heads, D)
    k4 = k.reshape(B, S, num_heads, D)
    v4 = v.reshape(B, S, num_heads, D)

    q_spec = pl.BlockSpec((1, tq, num_heads, D), lambda b, qi: (b, qi, 0, 0))
    kv_spec = pl.BlockSpec((1, S, num_heads, D), lambda b, qi: (b, 0, 0, 0))
    out_spec = pl.BlockSpec((1, tq, H), lambda b, qi: (b, qi, 0))

    itemsize = jnp.dtype(q.dtype).itemsize
    flops = int(4 * B * num_heads * S * S * D)        # QK^T + PV
    transcendentals = int(B * num_heads * S * S)      # exp
    bytes_accessed = int(itemsize * B * S * H * (2 + 2 * n_q))

    kernel = functools.partial(
        _mha_kernel, scale=scale, matmul_dtype=matmul_dtype,
        softmax_dtype=softmax_dtype, approx_recip=approx_recip,
        structured_merge=_structured_merge_ok(num_heads, tq, D))

    return pl.pallas_call(
        kernel,
        out_shape=jax.ShapeDtypeStruct((B, S, H), out_dtype),
        grid=(B, n_q),
        in_specs=[q_spec, kv_spec, kv_spec],
        out_specs=out_spec,
        compiler_params=pltpu.CompilerParams(
            dimension_semantics=("parallel", "parallel"),
            vmem_limit_bytes=_vmem_limit_bytes()),
        cost_estimate=pl.CostEstimate(
            flops=flops, transcendentals=transcendentals,
            bytes_accessed=bytes_accessed),
    )(q4, k4, v4)


# ----------------------------------------------------------------------------
# Full Attention module forward
# ----------------------------------------------------------------------------
def attention_forward(hidden_states, params, num_heads, *,
                      matmul_dtype=jnp.bfloat16, softmax_dtype=None,
                      approx_recip=True, tm=None, q_block=256):
    """hidden_states: (B, S, H) -> (B, S, H). Matches the PyTorch module (eval).

    Default path: bf16 MXU operands, bf16 intermediates between kernels, f32
    accumulation and f32 softmax statistics. Pass matmul_dtype=None and
    approx_recip=False for a bit-tight f32 path.
    """
    B, S, H = hidden_states.shape
    if tm is None:
        tm = _default_tm()
    if softmax_dtype is None:
        # bf16 exp only where the EUP supports it (v6e/v7x); f32 on v5e/older.
        softmax_dtype = (jnp.bfloat16
                         if (matmul_dtype is not None and _has_bf16_vpu_eup())
                         else jnp.float32)
    # bf16 intermediates halve HBM traffic for q/k/v/ctx between the kernels.
    inter_dtype = hidden_states.dtype if matmul_dtype is None else matmul_dtype

    x2d = hidden_states.reshape(B * S, H)

    # Fused Q/K/V projection: x read from HBM once, one pipelined kernel.
    q, k, v = fused_linear(
        x2d,
        [params["wq"], params["wk"], params["wv"]],
        [params["bq"], params["bk"], params["bv"]],
        tm=tm, matmul_dtype=matmul_dtype, out_dtype=inter_dtype)

    # Scaled dot-product attention + softmax; emits (B, S, H) heads-merged.
    ctx = multi_head_attention(
        q.reshape(B, S, H), k.reshape(B, S, H), v.reshape(B, S, H),
        num_heads=num_heads, matmul_dtype=matmul_dtype,
        softmax_dtype=softmax_dtype, approx_recip=approx_recip,
        q_block=q_block, out_dtype=inter_dtype)

    # Output projection (no transpose needed on ctx).
    out, = fused_linear(
        ctx.reshape(B * S, H), [params["wo"]], [params["bo"]],
        tm=tm, matmul_dtype=matmul_dtype, out_dtype=hidden_states.dtype)
    return out.reshape(B, S, H)


# ----------------------------------------------------------------------------
# Pure-JAX reference for sanity checking
# ----------------------------------------------------------------------------
def attention_reference(hidden_states, params, num_heads):
    B, S, H = hidden_states.shape
    D = H // num_heads
    q = hidden_states @ params["wq"] + params["bq"]
    k = hidden_states @ params["wk"] + params["bk"]
    v = hidden_states @ params["wv"] + params["bv"]

    def split(t):
        return t.reshape(B, S, num_heads, D).transpose(0, 2, 1, 3)

    q, k, v = split(q), split(k), split(v)
    scores = jnp.einsum("bhqd,bhkd->bhqk", q, k) / math.sqrt(D)
    probs = jax.nn.softmax(scores, axis=-1)
    ctx = jnp.einsum("bhqk,bhkd->bhqd", probs, v)
    ctx = ctx.transpose(0, 2, 1, 3).reshape(B, S, H)
    return ctx @ params["wo"] + params["bo"]


if __name__ == "__main__":
    # Small config consistent with the module: hidden_size=32, num_heads=4,
    # batch=2, seq=8.
    B, S, H = 2, 8, 32
    NUM_HEADS = 4

    key = jax.random.PRNGKey(0)
    keys = jax.random.split(key, 9)

    def init_w(k_, shape):
        return jax.random.normal(k_, shape, dtype=jnp.float32) * 0.05

    params = {
        "wq": init_w(keys[0], (H, H)), "bq": init_w(keys[1], (H,)),
        "wk": init_w(keys[2], (H, H)), "bk": init_w(keys[3], (H,)),
        "wv": init_w(keys[4], (H, H)), "bv": init_w(keys[5], (H,)),
        "wo": init_w(keys[6], (H, H)), "bo": init_w(keys[7], (H,)),
    }

    hidden_states = jax.random.normal(keys[8], (B, S, H), dtype=jnp.float32)

    ref = attention_reference(hidden_states, params, NUM_HEADS)

    # Default path: bf16 MXU + bf16 intermediates (f32 accum / f32 softmax stats).
    out = attention_forward(hidden_states, params, NUM_HEADS)
    out = jax.block_until_ready(out)
    assert out.shape == (B, S, H)
    assert out.dtype == hidden_states.dtype
    assert jnp.allclose(out, ref, atol=7.5e-2, rtol=7.5e-2), "bf16 mismatch vs reference"

    # Exact f32 path (f32 MXU operands, exact reciprocal): tight tolerance.
    out_f32 = attention_forward(hidden_states, params, NUM_HEADS,
                                matmul_dtype=None, approx_recip=False)
    out_f32 = jax.block_until_ready(out_f32)
    assert jnp.allclose(out_f32, ref, atol=1e-4, rtol=1e-4), "f32 mismatch vs reference"

    print("KERNEL_OK")
</pallas_src>

<mosaic_0001>
module attributes {stable_mosaic.version = 11 : i64} {
  func.func @_fused_linear_kernel(%arg0: i32, %arg1: memref<16x32xf32, #tpu.memory_space<vmem>>, %arg2: memref<32x32xf32, #tpu.memory_space<vmem>>, %arg3: memref<32x32xf32, #tpu.memory_space<vmem>>, %arg4: memref<32x32xf32, #tpu.memory_space<vmem>>, %arg5: memref<1x32xf32, #tpu.memory_space<vmem>>, %arg6: memref<1x32xf32, #tpu.memory_space<vmem>>, %arg7: memref<1x32xf32, #tpu.memory_space<vmem>>, %arg8: memref<16x32xbf16, #tpu.memory_space<vmem>>, %arg9: memref<16x32xbf16, #tpu.memory_space<vmem>>, %arg10: memref<16x32xbf16, #tpu.memory_space<vmem>>) attributes {dimension_semantics = [#tpu.dimension_semantics<parallel>], iteration_bounds = array<i64: 1>, scalar_prefetch = 0 : i64, scratch_operands = 0 : i64, tpu.core_type = #tpu.core_type<tc>, window_params = [{transform_indices = @transform_0, window_bounds = array<i64: 16, 32>}, {pipeline_mode = #tpu.pipeline_mode<synchronous>, transform_indices = @transform_1, window_bounds = array<i64: 32, 32>}, {pipeline_mode = #tpu.pipeline_mode<synchronous>, transform_indices = @transform_2, window_bounds = array<i64: 32, 32>}, {pipeline_mode = #tpu.pipeline_mode<synchronous>, transform_indices = @transform_3, window_bounds = array<i64: 32, 32>}, {pipeline_mode = #tpu.pipeline_mode<synchronous>, transform_indices = @transform_4, window_bounds = array<i64: 1, 32>}, {pipeline_mode = #tpu.pipeline_mode<synchronous>, transform_indices = @transform_5, window_bounds = array<i64: 1, 32>}, {pipeline_mode = #tpu.pipeline_mode<synchronous>, transform_indices = @transform_6, window_bounds = array<i64: 1, 32>}, {transform_indices = @transform_7, window_bounds = array<i64: 16, 32>}, {transform_indices = @transform_8, window_bounds = array<i64: 16, 32>}, {transform_indices = @transform_9, window_bounds = array<i64: 16, 32>}]} {
    %c0 = arith.constant 0 : index
    %c0_0 = arith.constant 0 : index
    %0 = vector.load %arg1[%c0, %c0_0] : memref<16x32xf32, #tpu.memory_space<vmem>>, vector<16x32xf32>
    %1 = arith.truncf %0 : vector<16x32xf32> to vector<16x32xbf16>
    %c0_1 = arith.constant 0 : index
    %c0_2 = arith.constant 0 : index
    %2 = vector.load %arg2[%c0_1, %c0_2] : memref<32x32xf32, #tpu.memory_space<vmem>>, vector<32x32xf32>
    %3 = arith.truncf %2 : vector<32x32xf32> to vector<32x32xbf16>
    %cst = arith.constant dense<0.000000e+00> : vector<16x32xf32>
    %4 = tpu.matmul %1, %3, %cst {dimension_numbers = #tpu.dot_dimension_numbers<[1], [0], [0], [1], [0, 0, 1, 1], [], []>} : vector<16x32xbf16>, vector<32x32xbf16>, vector<16x32xf32> -> vector<16x32xf32>
    %c0_3 = arith.constant 0 : index
    %c0_4 = arith.constant 0 : index
    %5 = vector.load %arg5[%c0_3, %c0_4] : memref<1x32xf32, #tpu.memory_space<vmem>>, vector<1x32xf32>
    %6 = vector.broadcast %5 : vector<1x32xf32> to vector<16x32xf32>
    %7 = arith.addf %4, %6 : vector<16x32xf32>
    %8 = arith.truncf %7 : vector<16x32xf32> to vector<16x32xbf16>
    %c0_5 = arith.constant 0 : index
    %c0_6 = arith.constant 0 : index
    %9 = vector.load %arg8[%c0_5, %c0_6] : memref<16x32xbf16, #tpu.memory_space<vmem>>, vector<16x32xbf16>
    tpu.vector_store %arg8[%c0_5, %c0_6], %8 {strides = array<i32>} : memref<16x32xbf16, #tpu.memory_space<vmem>>, vector<16x32xbf16>,
    %c0_7 = arith.constant 0 : index
    %c0_8 = arith.constant 0 : index
    %10 = vector.load %arg3[%c0_7, %c0_8] : memref<32x32xf32, #tpu.memory_space<vmem>>, vector<32x32xf32>
    %11 = arith.truncf %10 : vector<32x32xf32> to vector<32x32xbf16>
    %cst_9 = arith.constant dense<0.000000e+00> : vector<16x32xf32>
    %12 = tpu.matmul %1, %11, %cst_9 {dimension_numbers = #tpu.dot_dimension_numbers<[1], [0], [0], [1], [0, 0, 1, 1], [], []>} : vector<16x32xbf16>, vector<32x32xbf16>, vector<16x32xf32> -> vector<16x32xf32>
    %c0_10 = arith.constant 0 : index
    %c0_11 = arith.constant 0 : index
    %13 = vector.load %arg6[%c0_10, %c0_11] : memref<1x32xf32, #tpu.memory_space<vmem>>, vector<1x32xf32>
    %14 = vector.broadcast %13 : vector<1x32xf32> to vector<16x32xf32>
    %15 = arith.addf %12, %14 : vector<16x32xf32>
    %16 = arith.truncf %15 : vector<16x32xf32> to vector<16x32xbf16>
    %c0_12 = arith.constant 0 : index
    %c0_13 = arith.constant 0 : index
    %17 = vector.load %arg9[%c0_12, %c0_13] : memref<16x32xbf16, #tpu.memory_space<vmem>>, vector<16x32xbf16>
    tpu.vector_store %arg9[%c0_12, %c0_13], %16 {strides = array<i32>} : memref<16x32xbf16, #tpu.memory_space<vmem>>, vector<16x32xbf16>,
    %c0_14 = arith.constant 0 : index
    %c0_15 = arith.constant 0 : index
    %18 = vector.load %arg4[%c0_14, %c0_15] : memref<32x32xf32, #tpu.memory_space<vmem>>, vector<32x32xf32>
    %19 = arith.truncf %18 : vector<32x32xf32> to vector<32x32xbf16>
    %cst_16 = arith.constant dense<0.000000e+00> : vector<16x32xf32>
    %20 = tpu.matmul %1, %19, %cst_16 {dimension_numbers = #tpu.dot_dimension_numbers<[1], [0], [0], [1], [0, 0, 1, 1], [], []>} : vector<16x32xbf16>, vector<32x32xbf16>, vector<16x32xf32> -> vector<16x32xf32>
    %c0_17 = arith.constant 0 : index
    %c0_18 = arith.constant 0 : index
    %21 = vector.load %arg7[%c0_17, %c0_18] : memref<1x32xf32, #tpu.memory_space<vmem>>, vector<1x32xf32>
    %22 = vector.broadcast %21 : vector<1x32xf32> to vector<16x32xf32>
    %23 = arith.addf %20, %22 : vector<16x32xf32>
    %24 = arith.truncf %23 : vector<16x32xf32> to vector<16x32xbf16>
    %c0_19 = arith.constant 0 : index
    %c0_20 = arith.constant 0 : index
    %25 = vector.load %arg10[%c0_19, %c0_20] : memref<16x32xbf16, #tpu.memory_space<vmem>>, vector<16x32xbf16>
    tpu.vector_store %arg10[%c0_19, %c0_20], %24 {strides = array<i32>} : memref<16x32xbf16, #tpu.memory_space<vmem>>, vector<16x32xbf16>,
    return
  }
  func.func @transform_0(%arg0: i32) -> (i32, i32) {
    %c0_i32 = arith.constant 0 : i32
    %c0_i32_0 = arith.constant 0 : i32
    return %arg0, %c0_i32 : i32, i32
  }
  func.func @transform_1(%arg0: i32) -> (i32, i32) {
    %c0_i32 = arith.constant 0 : i32
    %c0_i32_0 = arith.constant 0 : i32
    %c0_i32_1 = arith.constant 0 : i32
    return %c0_i32, %c0_i32_0 : i32, i32
  }
  func.func @transform_2(%arg0: i32) -> (i32, i32) {
    %c0_i32 = arith.constant 0 : i32
    %c0_i32_0 = arith.constant 0 : i32
    %c0_i32_1 = arith.constant 0 : i32
    return %c0_i32, %c0_i32_0 : i32, i32
  }
  func.func @transform_3(%arg0: i32) -> (i32, i32) {
    %c0_i32 = arith.constant 0 : i32
    %c0_i32_0 = arith.constant 0 : i32
    %c0_i32_1 = arith.constant 0 : i32
    return %c0_i32, %c0_i32_0 : i32, i32
  }
  func.func @transform_4(%arg0: i32) -> (i32, i32) {
    %c0_i32 = arith.constant 0 : i32
    %c0_i32_0 = arith.constant 0 : i32
    %c0_i32_1 = arith.constant 0 : i32
    return %c0_i32, %c0_i32_0 : i32, i32
  }
  func.func @transform_5(%arg0: i32) -> (i32, i32) {
    %c0_i32 = arith.constant 0 : i32
    %c0_i32_0 = arith.constant 0 : i32
    %c0_i32_1 = arith.constant 0 : i32
    return %c0_i32, %c0_i32_0 : i32, i32
  }
  func.func @transform_6(%arg0: i32) -> (i32, i32) {
    %c0_i32 = arith.constant 0 : i32
    %c0_i32_0 = arith.constant 0 : i32
    %c0_i32_1 = arith.constant 0 : i32
    return %c0_i32, %c0_i32_0 : i32, i32
  }
  func.func @transform_7(%arg0: i32) -> (i32, i32) {
    %c0_i32 = arith.constant 0 : i32
    %c0_i32_0 = arith.constant 0 : i32
    return %arg0, %c0_i32 : i32, i32
  }
  func.func @transform_8(%arg0: i32) -> (i32, i32) {
    %c0_i32 = arith.constant 0 : i32
    %c0_i32_0 = arith.constant 0 : i32
    return %arg0, %c0_i32 : i32, i32
  }
  func.func @transform_9(%arg0: i32) -> (i32, i32) {
    %c0_i32 = arith.constant 0 : i32
    %c0_i32_0 = arith.constant 0 : i32
    return %arg0, %c0_i32 : i32, i32
  }
}

</mosaic_0001>

<bundles_post_ra>
// kernel: tpu_custom_call.1
= control target key start
LH: loop header
LB: loop body
LE: loop exit
PB: predicated region body
PF: predicated region fallthrough
CT: control target
= control target key end

     0   :  { %15 = vsyncpa [#allocation3], 0  ;;  %s674_s0 = inlined_call_operand.hbm [shape: f32[16,32], index: 0, kind: input, shape index: {}]   ;;  %s675_s1 = inlined_call_operand.hbm [shape: f32[32,32], index: 1, kind: input, shape index: {}]   ;;  %s676_s2 = inlined_call_operand.hbm [shape: f32[32,32], index: 2, kind: input, shape index: {}]   ;;  %s677_s3 = inlined_call_operand.hbm [shape: f32[32,32], index: 3, kind: input, shape index: {}]   ;;  %s678_s4 = inlined_call_operand.vmem [shape: f32[1,32], index: 4, kind: input, shape index: {}]   ;;  %s679_s5 = inlined_call_operand.vmem [shape: f32[1,32], index: 5, kind: input, shape index: {}]   ;;  %s680_s6 = inlined_call_operand.vmem [shape: f32[1,32], index: 6, kind: input, shape index: {}]   ;;  %s681_s7 = inlined_call_operand.hbm [shape: bf16[16,32], index: 7, kind: output, shape index: {0}]   ;;  %s682_s8 = inlined_call_operand.hbm [shape: bf16[16,32], index: 8, kind: output, shape index: {1}]   ;;  %s683_s9 = inlined_call_operand.hbm [shape: bf16[16,32], index: 9, kind: output, shape index: {2}]  }
   0x1   :  { %16 = vsyncpa [#allocation6], 0 }
   0x2   :  { %17 = vsyncpa [#allocation9], 0 }
   0x3   :  { %18 = vsyncpa [#allocation4], 0 }
   0x4   :  { %19 = vsyncpa [#allocation12], 0  ;;  %s551_s30 = smov [#allocation5]   ;;  %s552_s11 = smov [#allocation2]  }
   0x5   :  { %s37_s10 = sshll.u32 %s551_s30, 4  ;;  %s25_s12 = sshll.u32 %s552_s11, 4  ;;  %s38_s10 = int_to_ptr.vmem [resolvable:$true] %s37_s10  ;;  %s26_s12 = int_to_ptr.vmem [resolvable:$true] %s25_s12 }
   0x6   :  { %s409_s13 = scalar_lea.vmem %s38_s10, 512  ;;  %p414_p1 = scmp.lt.s32.totalorder %s38_s10, %s38_s10 }
   0x7   :  { %p410_p0 = scmp.ne.s32.totalorder %s38_s10, %s409_s13  ;;  %p415_p2 = scmp.lt.s32.totalorder %s409_s13, %s409_s13 }
   0x9   :  { %p416_p3 = por %p415_p2, %p414_p1 }
   0xb   :  { %p417_p4 = pnand %p416_p3, %p410_p0 }
   0xd   :  { %420 = shalt.err (!%p417_p4)
}
   0xe   :  { %s553_s14 = smov 128   ;;  %s554_s15 = smov 8  }
   0xf   :  { %43 = dma.hbm_to_vmem [thread:$0]  %s675_s1, 512, %s38_s10, [#allocation6], %s553_s14, %s553_s14, %s554_s15  }
  0x10   :  { %s429_s18 = scalar_lea.vmem %s26_s12, 256  ;;  %p434_p6 = scmp.lt.s32.totalorder %s26_s12, %s26_s12 }
  0x11   :  { %p430_p5 = scmp.ne.s32.totalorder %s26_s12, %s429_s18  ;;  %p435_p7 = scmp.lt.s32.totalorder %s429_s18, %s429_s18 }
  0x13   :  { %p436_p8 = por %p435_p7, %p434_p6 }
  0x15   :  { %p437_p9 = pnand %p436_p8, %p430_p5 }
  0x17   :  { %440 = shalt.err (!%p437_p9)
}
  0x18   :  { %31 = dma.hbm_to_vmem [thread:$0]  %s674_s0, 256, %s26_s12, [#allocation3], %s553_s14, %s553_s14, %s554_s15  }
  0x19   :  { %s555_s21 = smov [#allocation7]   ;;  %s556_s23 = smov [#allocation8]  }
  0x1a   :  { %s49_s22 = sshll.u32 %s555_s21, 4  ;;  %s61_s24 = sshll.u32 %s556_s23, 4  ;;  %s50_s22 = int_to_ptr.vmem [resolvable:$true] %s49_s22  ;;  %s62_s24 = int_to_ptr.vmem [resolvable:$true] %s61_s24 }
  0x1b   :  { %s449_s1 = scalar_lea.vmem %s50_s22, 512  ;;  %p454_p11 = scmp.lt.s32.totalorder %s50_s22, %s50_s22 }
  0x1c   :  { %p450_p10 = scmp.ne.s32.totalorder %s50_s22, %s449_s1  ;;  %p455_p12 = scmp.lt.s32.totalorder %s449_s1, %s449_s1 }
  0x1e   :  { %p456_p13 = por %p455_p12, %p454_p11 }
  0x20   :  { %p457_p0 = pnand %p456_p13, %p450_p10 }
  0x22   :  { %460 = shalt.err (!%p457_p0)
}
  0x23   :  { %55 = dma.hbm_to_vmem [thread:$0]  %s676_s2, 512, %s50_s22, [#allocation6], %s553_s14, %s553_s14, %s554_s15  }
  0x24   :  { %s469_s0 = scalar_lea.vmem %s62_s24, 512  ;;  %p474_p2 = scmp.lt.s32.totalorder %s62_s24, %s62_s24 }
  0x25   :  { %p470_p1 = scmp.ne.s32.totalorder %s62_s24, %s469_s0  ;;  %p475_p3 = scmp.lt.s32.totalorder %s469_s0, %s469_s0 }
  0x27   :  { %p476_p4 = por %p475_p3, %p474_p2 }
  0x29   :  { %p477_p5 = pnand %p476_p4, %p470_p1 }
  0x2b   :  { %480 = shalt.err (!%p477_p5)
}
  0x2c   :  { %67 = dma.hbm_to_vmem [thread:$0]  %s677_s3, 512, %s62_s24, [#allocation9], %s553_s14, %s553_s14, %s554_s15  }
  0x2d   :  { %541 = dma.done.wait [#allocation3], 256  }
  0x2e   :  { %542 = vsyncadd [#allocation3], 4294967040 }
  0x2f   :  { %543 = dma.done.wait [#allocation6], 1024  }
  0x30   :  { %544 = vsyncadd [#allocation6], 4294966272 }
  0x31   :  { %545 = dma.done.wait [#allocation9], 512  }
  0x32   :  { %546 = vsyncadd [#allocation9], 4294966784  ;;  %v557_v0 = vmov 0.0   ;;  %vm558_vm0 = vmmov 0   ;;  %v92_v1 = vld [vmem:[#allocation5 + $0x10] sm:$0xff]  ;;  %v93_v2 = vld [vmem:[#allocation5 + $0x18] sm:$0xff] }
  0x33   :  { %364 = vmatprep.subr.bf16.mxu0 %v557_v0  ;;  %372 = vmatprep.subr.bf16.mxu1 %v557_v0  ;;  %v161_v3 = vld [vmem:[#allocation7 + $0x10] sm:$0xff]  ;;  %v95_v4 = vpack.c.bf16 %v93_v2, %v92_v1  ;;  %v162_v5 = vld [vmem:[#allocation7 + $0x18] sm:$0xff]  ;;  %v90_v6 = vld [vmem:[#allocation5] sm:$0xff]  ;;  %vm103_vm1 = vcmask 261120   ;;  %vm156_vm2 = vcmask 257024   ;;  %s559_s10 = smov [#allocation10]  }
  0x34   :  { %368 = vmatprep.mubr.msk.bf16.mxu0 %vm558_vm0, %v557_v0  ;;  %376 = vmatprep.mubr.msk.bf16.mxu1 %vm558_vm0, %v557_v0  ;;  %v91_v7 = vld [vmem:[#allocation5 + $0x8] sm:$0xff]  ;;  %v164_v8 = vpack.c.bf16 %v162_v5, %v161_v3  ;;  %v159_v9 = vld [vmem:[#allocation7] sm:$0xff]  ;;  %v87_v12 = vld [vmem:[#allocation2] sm:$0xff]  ;;  %s292_s11 = sshll.u32 %s559_s10, 4  ;;  %s293_s11 = int_to_ptr.vmem [resolvable:$true] %s292_s11 }
  0x35   :  { %v160_v10 = vld [vmem:[#allocation7 + $0x8] sm:$0xff]  ;;  %365 = vmatpush3.bf16.msra.mxu0 %v95_v4  ;;  %v94_v11 = vpack.c.bf16 %v91_v7, %v90_v6  ;;  %v88_v13 = vld [vmem:[#allocation2 + $0x8] sm:$0xff]  ;;  %v225_v15 = vld [vmem:[#allocation8 + $0x10] sm:$0xff]  ;;  %s481_s14 = scalar_lea.vmem %s293_s11, 128  ;;  %p486_p7 = scmp.lt.s32.totalorder %s293_s11, %s293_s11 }
  0x36   :  { %373 = vmatpush3.bf16.msra.mxu1 %v164_v8  ;;  %366 = vmatprep.subr.bf16.mxu0 %v557_v0  ;;  %v163_v14 = vpack.c.bf16 %v160_v10, %v159_v9  ;;  %v226_v16 = vld [vmem:[#allocation8 + $0x18] sm:$0xff]  ;;  %v89_v17 = vpack.c.bf16 %v88_v13, %v87_v12  ;;  %v223_v19 = vld [vmem:[#allocation8] sm:$0xff]  ;;  %v224_v20 = vld [vmem:[#allocation8 + $0x8] sm:$0xff]  ;;  %p482_p6 = scmp.ne.s32.totalorder %s293_s11, %s481_s14  ;;  %p487_p8 = scmp.lt.s32.totalorder %s481_s14, %s481_s14 }
  0x37   :  { %374 = vmatprep.subr.bf16.mxu1 %v557_v0  ;;  %v228_v18 = vpack.c.bf16 %v226_v16, %v225_v15  ;;  %v227_v21 = vpack.c.bf16 %v224_v20, %v223_v19  ;;  %v337_v22 = vld [vmem:[%s678_s4] ss:$0 sm:$0xff]  ;;  %s560_s4 = smov [#allocation11]  }
  0x38   :  { %v341_v23 = vld [vmem:[%s679_s5] ss:$0 sm:$0xff]  ;;  %s304_s12 = sshll.u32 %s560_s4, 4  ;;  %p488_p9 = por %p487_p8, %p486_p7  ;;  %s305_s12 = int_to_ptr.vmem [resolvable:$true] %s304_s12 }
  0x39   :  { %367 = vmatpush3.bf16.msra.mxu0 %v94_v11  ;;  %v345_v37 = vld [vmem:[%s680_s6] ss:$0 sm:$0xff] }
  0x3a   :  { %375 = vmatpush3.bf16.msra.mxu1 %v163_v14  ;;  %380 = vmatprep.subr.bf16.mxu0 %v557_v0  ;;  %p489_p10 = pnand %p488_p9, %p482_p6 }
  0x3c   :  { %369 = vmatmul.mubr.msk.bf16.vlgmr.msra.gmra.mxu0 %vm103_vm1, %v89_v17 }
  0x3d   :  { %381 = vmatpush3.bf16.msra.mxu0 %v228_v18  ;;  %377 = vmatmul.mubr.msk.bf16.vlgmr.msra.gmra.mxu1 %vm103_vm1, %v89_v17 }
  0x3e   :  { %382 = vmatprep.subr.bf16.mxu0 %v557_v0  ;;  %384 = vmatprep.mubr.msk.bf16.mxu0 %vm558_vm0, %v557_v0 }
  0x41   :  { %383 = vmatpush3.bf16.msra.mxu0 %v227_v21 }
  0x44   :  { %385 = vmatmul.mubr.msk.bf16.vlgmr.msra.gmra.mxu0 %vm103_vm1, %v89_v17 }
  0xfc   :  { %v141_v24 = vpop.f32.mrf.mxu0 }
  0xfd   :  { %v142_v25 = vadd.f32 %v337_v22, %v141_v24  ;;  %v206_v26 = vpop.f32.mrf.mxu1 }
  0xfe   :  { %v370_v27 = vpop.f32.mrf.mxu0  ;;  %v207_v28 = vadd.f32 %v341_v23, %v206_v26 }
  0xff   :  { %v349_v29 = vpack.c.bf16 %v142_v25, %v142_v25  ;;  %v378_v30 = vpop.f32.mrf.mxu1 }
 0x100   :  { %v351_v31 = vpack.c.bf16 %v207_v28, %v207_v28  ;;  %v144_v32 = vpop.f32.mrf.mxu0 }
 0x101   :  { %157 = vst.msk [vmem:[#allocation10] sm:$0xf] %vm156_vm2, %v349_v29  ;;  %v145_v33 = vadd.f32 %v337_v22, %v144_v32  ;;  %v209_v34 = vpop.f32.mrf.mxu1 }
 0x102   :  { %221 = vst.msk [vmem:[#allocation11] sm:$0xf] %vm156_vm2, %v351_v31  ;;  %v371_v35 = vpop.f32.mrf.mxu0  ;;  %v210_v36 = vadd.f32 %v341_v23, %v209_v34 }
 0x103   :  { %v350_v38 = vpack.c.bf16 %v145_v33, %v145_v33  ;;  %v379_v39 = vpop.f32.mrf.mxu1 }
 0x104   :  { %v352_v40 = vpack.c.bf16 %v210_v36, %v210_v36  ;;  %v270_v41 = vpop.f32.mrf.mxu0 }
 0x105   :  { %158 = vst.msk [vmem:[#allocation10 + $0x4] sm:$0xf] %vm156_vm2, %v350_v38  ;;  %v271_v42 = vadd.f32 %v345_v37, %v270_v41 }
 0x106   :  { %222 = vst.msk [vmem:[#allocation11 + $0x4] sm:$0xf] %vm156_vm2, %v352_v40  ;;  %v386_v43 = vpop.f32.mrf.mxu0 }
 0x107   :  { %492 = shalt.err (!%p489_p10)
}
 0x108   :  { %s561_s6 = smov 64   ;;  %s562_s15 = smov 4   ;;  %v353_v44 = vpack.c.bf16 %v271_v42, %v271_v42 }
 0x109   :  { %298 = dma.vmem_to_hbm [thread:$0]  %s293_s11, 128, %s681_s7, [#allocation4], %s561_s6, %s561_s6, %s562_s15  }
 0x10a   :  { %s501_s18 = scalar_lea.vmem %s305_s12, 128  ;;  %p506_p12 = scmp.lt.s32.totalorder %s305_s12, %s305_s12 }
 0x10b   :  { %p502_p11 = scmp.ne.s32.totalorder %s305_s12, %s501_s18  ;;  %p507_p13 = scmp.lt.s32.totalorder %s501_s18, %s501_s18 }
 0x10d   :  { %p508_p0 = por %p507_p13, %p506_p12 }
 0x10f   :  { %p509_p1 = pnand %p508_p0, %p502_p11 }
 0x111   :  { %512 = shalt.err (!%p509_p1)
}
 0x112   :  { %310 = dma.vmem_to_hbm [thread:$0]  %s305_s12, 128, %s682_s8, [#allocation12], %s561_s6, %s561_s6, %s562_s15   ;;  %v273_v45 = vpop.f32.mrf.mxu0  ;;  %285 = vst.msk [vmem:[#allocation13] sm:$0xf] %vm156_vm2, %v353_v44 }
 0x113   :  { %s563_s21 = smov [#allocation13]   ;;  %v274_v46 = vadd.f32 %v345_v37, %v273_v45 }
 0x114   :  { %s316_s22 = sshll.u32 %s563_s21, 4  ;;  %v387_v47 = vpop.f32.mrf.mxu0  ;;  %s317_s22 = int_to_ptr.vmem [resolvable:$true] %s316_s22 }
 0x115   :  { %v354_v48 = vpack.c.bf16 %v274_v46, %v274_v46  ;;  %s521_s7 = scalar_lea.vmem %s317_s22, 128  ;;  %p526_p3 = scmp.lt.s32.totalorder %s317_s22, %s317_s22 }
 0x116   :  { %p522_p2 = scmp.ne.s32.totalorder %s317_s22, %s521_s7  ;;  %p527_p4 = scmp.lt.s32.totalorder %s521_s7, %s521_s7 }
 0x117   :  { %286 = vst.msk [vmem:[#allocation13 + $0x4] sm:$0xf] %vm156_vm2, %v354_v48 }
 0x118   :  { %p528_p5 = por %p527_p4, %p526_p3 }
 0x11a   :  { %p529_p6 = pnand %p528_p5, %p522_p2 }
 0x11c   :  { %532 = shalt.err (!%p529_p6)
}
 0x11d   :  { %322 = dma.vmem_to_hbm [thread:$0]  %s317_s22, 128, %s683_s9, [#allocation12], %s561_s6, %s561_s6, %s562_s15  }
 0x11e   :  { %547 = dma.done.wait [#allocation4], 128  }
 0x11f   :  { %548 = vsyncadd [#allocation4], 4294967168 }
 0x120   :  { %549 = dma.done.wait [#allocation12], 256  }
 0x121   :  { %550 = vsyncadd [#allocation12], 4294967040 }
 0x122   :  { %332 = vsyncpa [#allocation3], 1 }
 0x123   :  { %333 = vsyncpa [#allocation6], 1 }
 0x124   :  { %334 = vsyncpa [#allocation9], 1 }
 0x125   :  { %335 = vsyncpa [#allocation4], 1 }
 0x126   :  { %336 = vsyncpa [#allocation12], 1 }

</bundles_post_ra>
